<compile_context>
chip_gen: v6e
topology: v6e:2x2x1
jax: 0.10.0
libtpu: 0.0.40
codegen_flags: <defaults>
</compile_context>

<pallas_src>
import functools

import jax
import jax.numpy as jnp
from jax import lax
from jax.experimental import pallas as pl
from jax.experimental.pallas import tpu as pltpu

_VMEM = pl.BlockSpec(memory_space=pltpu.MemorySpace.VMEM)
_BIG = 1e30


def _round_up(v, m):
    return (v + m - 1) // m * m


# ----------------------------- Pallas kernels ------------------------------

def _linear_kernel(x_ref, w_ref, b_ref, o_ref):
    o_ref[...] = (
        jnp.dot(x_ref[...], w_ref[...], preferred_element_type=jnp.float32)
        + b_ref[...]
    )


def linear(x, w, b):
    n, h = x.shape[0], w.shape[1]
    return pl.pallas_call(
        _linear_kernel,
        out_shape=jax.ShapeDtypeStruct((n, h), jnp.float32),
        in_specs=[_VMEM, _VMEM, _VMEM],
        out_specs=_VMEM,
    )(x, w, b.reshape(1, h))


def _pna_layer_kernel(*refs, has_atten, node_tile):
    if has_atten:
        (x_ref, eattr_ref, src_oh_ref, dst_oh_ref, scales_ref, w_post_ref,
         b_post_ref, eatt_ref,
         o_ref, s1_ref, s2_ref, mn_ref, mx_ref) = refs
    else:
        (x_ref, eattr_ref, src_oh_ref, dst_oh_ref, scales_ref, w_post_ref,
         b_post_ref,
         o_ref, s1_ref, s2_ref, mn_ref, mx_ref) = refs
        eatt_ref = None

    i = pl.program_id(0)                              # node-tile index
    j = pl.program_id(1)                              # edge-chunk index

    @pl.when(j == 0)
    def _init():
        s1_ref[...] = jnp.zeros_like(s1_ref)
        s2_ref[...] = jnp.zeros_like(s2_ref)
        mn_ref[...] = jnp.full_like(mn_ref, _BIG)
        mx_ref[...] = jnp.full_like(mx_ref, -_BIG)

    row0 = pl.multiple_of(i * node_tile, 8)
    x_tile = x_ref[pl.ds(row0, node_tile), :]         # [Tn, H] f32
    xb = x_ref[...].astype(jnp.bfloat16)              # [N, H] bf16 (gathers)
    src_oh = src_oh_ref[...]                          # [tE, N]  bf16
    dst_oh = dst_oh_ref[...]                          # [tE, Tn] bf16

    # gather endpoint features for this edge chunk (MXU, bf16 x bf16 -> f32);
    # edges whose target falls outside this node tile get x_i = 0, but their
    # dst one-hot row is all-zero so they contribute nothing downstream.
    x_i = jnp.dot(dst_oh, x_tile.astype(jnp.bfloat16),
                  preferred_element_type=jnp.float32)            # targets
    x_j = jnp.dot(src_oh, xb, preferred_element_type=jnp.float32)  # sources
    h = jnp.concatenate([x_i, x_j, eattr_ref[...]], axis=-1)     # [tE, 3H]
    if has_atten:
        h = h * eatt_ref[...]                                    # [tE, 1]

    # scatter-add per target node: transposed contraction on the MXU
    # ([tE, Tn]^T . [tE, 3H]); no separate [N, E] mask input needed.
    dn = (((0,), (0,)), ((), ()))
    hb = h.astype(jnp.bfloat16)
    hsqb = (h * h).astype(jnp.bfloat16)
    s1_ref[...] += lax.dot_general(dst_oh, hb, dn,
                                   preferred_element_type=jnp.float32)
    s2_ref[...] += lax.dot_general(dst_oh, hsqb, dn,
                                   preferred_element_type=jnp.float32)

    # masked running min / max; VPU work bounded by (edge tile x node tile)
    has_edge = dst_oh[:, :, None] > 0                 # [tE, Tn, 1]
    hc = h[:, None, :]                                # [tE, 1, 3H]
    mn_ref[...] = jnp.minimum(
        mn_ref[...], jnp.min(jnp.where(has_edge, hc, _BIG), axis=0))
    mx_ref[...] = jnp.maximum(
        mx_ref[...], jnp.max(jnp.where(has_edge, hc, -_BIG), axis=0))

    @pl.when(j == pl.num_programs(1) - 1)
    def _finalize():
        inv_deg = scales_ref[:, 0:1]                  # hoisted on the host
        amp = scales_ref[:, 1:2]
        att = scales_ref[:, 2:3]
        iso = scales_ref[:, 3:4]
        mean = s1_ref[...] * inv_deg
        mean_sq = s2_ref[...] * inv_deg
        std = jnp.sqrt(jnp.maximum(mean_sq - mean * mean, 0.0) + 1e-5)
        mn_v = jnp.where(iso > 0.0, 0.0, mn_ref[...])   # empty segment -> 0
        mx_v = jnp.where(iso > 0.0, 0.0, mx_ref[...])
        agg = jnp.concatenate([mean, mn_v, mx_v, std], axis=-1)  # [Tn, 12H]

        # per-scaler matmuls: amp / att are per-row scalars, so they commute
        # past the matmul -> no [Tn, 36H] concat is ever materialised.
        y = jnp.dot(agg, w_post_ref[0], preferred_element_type=jnp.float32)
        y += amp * jnp.dot(agg, w_post_ref[1],
                           preferred_element_type=jnp.float32)
        y += att * jnp.dot(agg, w_post_ref[2],
                           preferred_element_type=jnp.float32)
        y += b_post_ref[...]           # eval-mode BatchNorm folded into W, b
        o_ref[...] = jnp.maximum(y, 0.0) + x_tile     # ReLU + residual


def pna_layer(x, edge_attr, src_oh, dst_oh, scales, w_post, b_post,
              edge_atten=None, *, node_tile, edge_tile):
    n_pad, hp = x.shape
    e_pad = src_oh.shape[0]
    assert e_pad % edge_tile == 0 and n_pad % node_tile == 0
    n_node_tiles = n_pad // node_tile
    n_edge_chunks = e_pad // edge_tile
    h3 = 3 * hp

    has_atten = edge_atten is not None
    kernel = functools.partial(_pna_layer_kernel, has_atten=has_atten,
                               node_tile=node_tile)

    in_specs = [
        pl.BlockSpec((n_pad, hp), lambda i, j: (0, 0)),           # x resident
        pl.BlockSpec((edge_tile, hp), lambda i, j: (j, 0)),       # edge_attr
        pl.BlockSpec((edge_tile, n_pad), lambda i, j: (j, 0)),    # src 1-hot
        pl.BlockSpec((edge_tile, node_tile), lambda i, j: (j, i)),  # dst 1hot
        pl.BlockSpec((node_tile, 4), lambda i, j: (i, 0)),        # scalers
        pl.BlockSpec((3, 12 * hp, hp), lambda i, j: (0, 0, 0)),   # post W
        pl.BlockSpec((1, hp), lambda i, j: (0, 0)),               # post bias
    ]
    args = [x, edge_attr, src_oh, dst_oh, scales, w_post,
            b_post.reshape(1, hp)]
    if has_atten:
        in_specs.append(pl.BlockSpec((edge_tile, 1), lambda i, j: (j, 0)))
        args.append(edge_atten)

    return pl.pallas_call(
        kernel,
        out_shape=jax.ShapeDtypeStruct((n_pad, hp), jnp.float32),
        grid_spec=pltpu.PrefetchScalarGridSpec(
            num_scalar_prefetch=0,
            grid=(n_node_tiles, n_edge_chunks),
            in_specs=in_specs,
            out_specs=pl.BlockSpec((node_tile, hp), lambda i, j: (i, 0)),
            scratch_shapes=[pltpu.VMEM((node_tile, h3), jnp.float32)
                            for _ in range(4)],
        ),
        compiler_params=pltpu.CompilerParams(
            dimension_semantics=("parallel", "arbitrary"),
            vmem_limit_bytes=48 * 1024 * 1024,
        ),
    )(*args)


def _pool_kernel(g_oh_ref, x_ref, o_ref):
    g_oh = g_oh_ref[...]                                          # [G, N]
    cnt = jnp.maximum(jnp.sum(g_oh, axis=1, keepdims=True), 1.0)
    o_ref[...] = (
        jnp.dot(g_oh, x_ref[...], preferred_element_type=jnp.float32) / cnt
    )


def global_mean_pool(x, graph_oh):
    g, h = graph_oh.shape[0], x.shape[1]
    return pl.pallas_call(
        _pool_kernel,
        out_shape=jax.ShapeDtypeStruct((g, h), jnp.float32),
        in_specs=[_VMEM, _VMEM],
        out_specs=_VMEM,
    )(graph_oh, x)


# ----------------------------- Model wrapper -------------------------------

class PNAPallas:
    """JAX/Pallas re-implementation of the PyTorch PNA forward pass (eval)."""

    def __init__(self, x_dim, edge_attr_dim, hidden_size, n_layers,
                 avg_log_deg, key, node_tile=128, edge_tile=256):
        assert edge_attr_dim > 0, "this port implements the edge-attr path"
        assert edge_tile % 8 == 0
        assert node_tile % 128 == 0       # dst one-hot lane-dim constraint
        self.n_layers = n_layers
        self.hidden = hidden_size
        self.hidden_pad = _round_up(hidden_size, 128)   # lane-dense features
        self.avg_log = float(avg_log_deg)
        self.node_tile = node_tile
        self.edge_tile = edge_tile

        h, hp = hidden_size, self.hidden_pad
        n_agg, n_scaler = 4, 3            # [mean,min,max,std] x [id,amp,att]

        keys = jax.random.split(key, 4 + 2 * n_layers)
        s = 0.1

        def pad_cols(w):
            return jnp.pad(w, ((0, 0), (0, hp - h)))

        self.w_node = pad_cols(
            s * jax.random.normal(keys[0], (x_dim, h), jnp.float32))
        self.b_node = jnp.pad(
            s * jax.random.normal(keys[1], (h,), jnp.float32), (0, hp - h))
        self.w_edge = pad_cols(
            s * jax.random.normal(keys[2], (edge_attr_dim, h), jnp.float32))
        self.b_edge = jnp.pad(
            s * jax.random.normal(keys[3], (h,), jnp.float32), (0, hp - h))

        self.layers = []
        for i in range(n_layers):
            # logical post_nn weight [36H, H], layout: scaler-major, then
            # aggregator [mean,min,max,std], then piece [x_i, x_j, e_attr].
            w_post = s * jax.random.normal(
                keys[4 + 2 * i], (n_scaler * n_agg * 3 * h, h), jnp.float32)
            b_post = s * jax.random.normal(
                keys[5 + 2 * i], (h,), jnp.float32)
            # BatchNorm1d fresh-module defaults (eval mode): gamma=1, beta=0,
            # running_mean=0, running_var=1, eps=1e-5.  Eval BN is affine, so
            # fold it into the post weights / bias (columns of W, shift of b).
            gamma = jnp.ones((h,), jnp.float32)
            beta = jnp.zeros((h,), jnp.float32)
            run_mean = jnp.zeros((h,), jnp.float32)
            run_var = jnp.ones((h,), jnp.float32)
            bn_scale = gamma / jnp.sqrt(run_var + 1e-5)
            bn_shift = beta - run_mean * bn_scale
            # split per scaler and zero-pad every h-wide piece to hp lanes so
            # in-kernel concats / matmuls stay 128-lane aligned.
            w5 = w_post.reshape(n_scaler, n_agg, 3, h, h) * bn_scale
            w5 = jnp.pad(w5, ((0, 0), (0, 0), (0, 0),
                              (0, hp - h), (0, hp - h)))
            w_post_pad = w5.reshape(n_scaler, n_agg * 3 * hp, hp)
            b_post_pad = jnp.pad(b_post * bn_scale + bn_shift, (0, hp - h))
            self.layers.append((w_post_pad, b_post_pad))

    def __call__(self, x, edge_index, batch, edge_attr, num_graphs,
                 edge_atten=None):
        n, e = x.shape[0], edge_index.shape[1]
        # node padding / tiling: the node tile must be a multiple of 128
        # (it is the dst one-hot lane dim) unless it covers all nodes.
        n_pad8 = _round_up(n, 8)
        if n_pad8 <= self.node_tile:
            nt, n_pad = n_pad8, n_pad8
        else:
            nt = self.node_tile
            n_pad = _round_up(n, nt)
        et = min(self.edge_tile, _round_up(e, 8))
        e_pad = _round_up(e, et)
        src, dst = edge_index[0], edge_index[1]

        # one-hot gather/scatter operators in bf16 (0/1 exact): halves the
        # O(E*N) HBM->VMEM traffic, accumulation stays f32 on the MXU.
        src_oh = jnp.pad(jax.nn.one_hot(src, n_pad, dtype=jnp.bfloat16),
                         ((0, e_pad - e), (0, 0)))                  # [Ep, Np]
        dst_oh = jnp.pad(jax.nn.one_hot(dst, n_pad, dtype=jnp.bfloat16),
                         ((0, e_pad - e), (0, 0)))                  # [Ep, Np]
        graph_oh = jnp.pad(
            jax.nn.one_hot(batch, num_graphs, dtype=jnp.float32).T,
            ((0, 0), (0, n_pad - n)))                               # [G, Np]

        # degree-derived scalers are identical for every layer -> hoisted.
        deg = jnp.zeros((n_pad,), jnp.float32).at[dst].add(1.0)
        deg_c = jnp.maximum(deg, 1.0)        # PNAConv clamps deg to >= 1
        inv_deg = 1.0 / deg_c
        amp = jnp.log(deg_c + 1.0) / self.avg_log
        att = self.avg_log / jnp.log(deg_c + 1.0)
        iso = (deg == 0.0).astype(jnp.float32)
        scales = jnp.stack([inv_deg, amp, att, iso], axis=1)        # [Np, 4]

        if edge_atten is not None:
            edge_atten = jnp.pad(
                edge_atten.reshape(e, 1).astype(jnp.float32),
                ((0, e_pad - e), (0, 0)))                           # [Ep, 1]

        x = jnp.pad(x.astype(jnp.float32), ((0, n_pad - n), (0, 0)))
        x = linear(x, self.w_node, self.b_node)                     # [Np, Hp]
        edge_attr = jnp.pad(edge_attr.astype(jnp.float32),
                            ((0, e_pad - e), (0, 0)))
        edge_attr = linear(edge_attr, self.w_edge, self.b_edge)     # [Ep, Hp]

        for (w_post, b_post) in self.layers:
            x = pna_layer(x, edge_attr, src_oh, dst_oh, scales,
                          w_post, b_post, edge_atten,
                          node_tile=nt, edge_tile=et)
            # TODO(synk): dropout omitted (identity in eval mode)

        pooled = global_mean_pool(x, graph_oh)                      # [G, Hp]
        return pooled[:, :self.hidden]


# --------------------------------- Driver -----------------------------------

if __name__ == "__main__":
    key = jax.random.PRNGKey(0)
    k_x, k_e, k_src, k_dst, k_params = jax.random.split(key, 5)

    # Small synthetic batched graph: 2 graphs x 8 nodes, 20 edges each.
    num_graphs = 2
    nodes_per_graph = 8
    n_nodes = num_graphs * nodes_per_graph
    edges_per_graph = 20
    x_dim, edge_attr_dim, hidden_size, n_layers = 8, 4, 32, 2

    x = jax.random.normal(k_x, (n_nodes, x_dim), jnp.float32)
    batch = jnp.repeat(jnp.arange(num_graphs, dtype=jnp.int32),
                       nodes_per_graph)

    src_list, dst_list = [], []
    for g in range(num_graphs):
        ks, kd = jax.random.split(jax.random.fold_in(k_src, g))
        s = jax.random.randint(ks, (edges_per_graph,), 0, nodes_per_graph)
        d = jax.random.randint(kd, (edges_per_graph,), 0, nodes_per_graph)
        src_list.append(s + g * nodes_per_graph)
        dst_list.append(d + g * nodes_per_graph)
    src = jnp.concatenate(src_list).astype(jnp.int32)
    dst = jnp.concatenate(dst_list).astype(jnp.int32)
    edge_index = jnp.stack([src, dst])                      # [2, E]
    n_edges = src.shape[0]

    edge_attr = jax.random.normal(k_e, (n_edges, edge_attr_dim), jnp.float32)

    # model_config['deg'] equivalent: in-degree histogram -> avg log degree.
    in_deg = jnp.sum(jax.nn.one_hot(dst, n_nodes, dtype=jnp.float32), axis=0)
    avg_log_deg = float(jnp.mean(jnp.log(in_deg + 1.0)))

    # edge_tile=32 so the demo actually exercises the multi-chunk
    # edge-streaming (scratch accumulator) path.
    model = PNAPallas(x_dim, edge_attr_dim, hidden_size, n_layers,
                      avg_log_deg, k_params, node_tile=128, edge_tile=32)

    out = model(x, edge_index, batch, edge_attr, num_graphs)
    out = jax.block_until_ready(out)
    assert out.shape == (num_graphs, hidden_size)
    assert bool(jnp.all(jnp.isfinite(out)))

    # also exercise the edge-attention path
    edge_atten = jax.nn.sigmoid(
        jax.random.normal(jax.random.fold_in(key, 7), (n_edges, 1),
                          jnp.float32))
    out_att = model(x, edge_index, batch, edge_attr, num_graphs, edge_atten)
    out_att = jax.block_until_ready(out_att)
    assert out_att.shape == (num_graphs, hidden_size)
    assert bool(jnp.all(jnp.isfinite(out_att)))

    print("KERNEL_OK")
</pallas_src>

<mosaic_0001>
module attributes {stable_mosaic.version = 11 : i64} {
  func.func @_linear_kernel(%arg0: memref<16x8xf32, #tpu.memory_space<vmem>>, %arg1: memref<8x128xf32, #tpu.memory_space<vmem>>, %arg2: memref<1x128xf32, #tpu.memory_space<vmem>>, %arg3: memref<16x128xf32, #tpu.memory_space<vmem>>) attributes {dimension_semantics = [], scalar_prefetch = 0 : i64, scratch_operands = 0 : i64, tpu.core_type = #tpu.core_type<tc>} {
    %c0 = arith.constant 0 : index
    %c0_0 = arith.constant 0 : index
    %0 = vector.load %arg0[%c0, %c0_0] : memref<16x8xf32, #tpu.memory_space<vmem>>, vector<16x8xf32>
    %c0_1 = arith.constant 0 : index
    %c0_2 = arith.constant 0 : index
    %1 = vector.load %arg1[%c0_1, %c0_2] : memref<8x128xf32, #tpu.memory_space<vmem>>, vector<8x128xf32>
    %cst = arith.constant dense<0.000000e+00> : vector<16x128xf32>
    %2 = tpu.matmul %0, %1, %cst {dimension_numbers = #tpu.dot_dimension_numbers<[1], [0], [0], [1], [0, 0, 1, 1], [], []>} : vector<16x8xf32>, vector<8x128xf32>, vector<16x128xf32> -> vector<16x128xf32>
    %c0_3 = arith.constant 0 : index
    %c0_4 = arith.constant 0 : index
    %3 = vector.load %arg2[%c0_3, %c0_4] : memref<1x128xf32, #tpu.memory_space<vmem>>, vector<1x128xf32>
    %4 = vector.broadcast %3 : vector<1x128xf32> to vector<16x128xf32>
    %5 = arith.addf %2, %4 : vector<16x128xf32>
    %c0_5 = arith.constant 0 : index
    %c0_6 = arith.constant 0 : index
    %6 = vector.load %arg3[%c0_5, %c0_6] : memref<16x128xf32, #tpu.memory_space<vmem>>, vector<16x128xf32>
    tpu.vector_store %arg3[%c0_5, %c0_6], %5 {strides = array<i32>} : memref<16x128xf32, #tpu.memory_space<vmem>>, vector<16x128xf32>,
    return
  }
}

</mosaic_0001>

<bundles_post_ra>
// kernel: tpu_custom_call.1
= control target key start
LH: loop header
LB: loop body
LE: loop exit
PB: predicated region body
PF: predicated region fallthrough
CT: control target
= control target key end

     0   :  { %vm25_vm0 = vcmask 64512   ;;  %s199_s0 = inlined_call_operand.vmem [shape: f32[16,8], index: 0, kind: input, shape index: {}]   ;;  %s200_s1 = inlined_call_operand.vmem [shape: f32[8,128], index: 1, kind: input, shape index: {}]   ;;  %s201_s2 = inlined_call_operand.vmem [shape: f32[1,128], index: 2, kind: input, shape index: {}]   ;;  %s202_s3 = inlined_call_operand.hbm [shape: f32[16,128], index: 3, kind: output, shape index: {}]  }
   0x1   :  { %v17_v0 = vld [vmem:[%s200_s1] sm:$0xff]  ;;  %v16_v2 = vld [vmem:[%s199_s0 + $0x8] sm:$0xff] }
   0x2   :  { %v15_v1 = vld [vmem:[%s199_s0] sm:$0xff]  ;;  %131 = vmatprep.subr.mxu0 %v17_v0 }
   0x3   :  { %133 = vmatprep.mubr.msk.f32.mxu0 %vm25_vm0, %v15_v1 }
   0x4   :  { %8 = vsyncpa [#allocation3], 0  ;;  %132 = vmatpush3.msra.mxu0 %v17_v0  ;;  %v125_v3 = vld [vmem:[%s201_s2] ss:$0 sm:$0xff]  ;;  %s161_s20 = smov [#allocation2]  }
   0x5   :  { %134 = vmatmul.mubr.msk.f32.vlgmr.msra.gmra.mxu0 %vm25_vm0, %v16_v2  ;;  %s114_s1 = sshll.u32 %s161_s20, 4  ;;  %s115_s1 = int_to_ptr.vmem [resolvable:$true] %s114_s1 }
   0x6   :  { %s139_s21 = scalar_lea.vmem %s115_s1, 256  ;;  %p144_p1 = scmp.lt.s32.totalorder %s115_s1, %s115_s1 }
   0x7   :  { %p140_p0 = scmp.ne.s32.totalorder %s115_s1, %s139_s21  ;;  %p145_p2 = scmp.lt.s32.totalorder %s139_s21, %s139_s21 }
   0x9   :  { %p146_p3 = por %p145_p2, %p144_p1 }
   0xb   :  { %p147_p4 = pnand %p146_p3, %p140_p0 }
  0xc5   :  { %v135_v4 = vpop.f32.mrf.mxu0 }
  0xc6   :  { %v104_v5 = vadd.f32 %v135_v4, %v125_v3 }
  0xc7   :  { %v98_v6 = vpop.f32.mrf.mxu0 }
  0xc8   :  { %108 = vst [vmem:[#allocation2 + $0x8] sm:$0xff] %v104_v5  ;;  %v99_v7 = vadd.f32 %v125_v3, %v98_v6 }
  0xca   :  { %107 = vst [vmem:[#allocation2] sm:$0xff] %v99_v7 }
  0xcb   :  { %150 = shalt.err (!%p147_p4)
}
  0xcc   :  { %s162_s0 = smov 128   ;;  %s163_s22 = smov 8  }
  0xcd   :  { %120 = dma.vmem_to_hbm [thread:$0]  %s115_s1, 256, %s202_s3, [#allocation3], %s162_s0, %s162_s0, %s163_s22  }
  0xce   :  { %159 = dma.done.wait [#allocation3], 256  }
  0xcf   :  { %160 = vsyncadd [#allocation3], 4294967040 }
  0xd0   :  { %124 = vsyncpa [#allocation3], 1 }

</bundles_post_ra>
